<compile_context>
chip_gen: v6e
topology: v6e:2x2x1
jax: 0.10.0
libtpu: 0.0.40
codegen_flags: <defaults>
</compile_context>

<pallas_src>
import functools
import math

import jax
import jax.numpy as jnp
from jax.experimental import pallas as pl
from jax.experimental.pallas import tpu as pltpu

_LANE = 128
_BATCH_TILE = 512  # rows per grid step when the batch-tiled path is used


def _round_up(n, m):
    return ((n + m - 1) // m) * m


def _make_fused_mlp_kernel(num_layers):
    """Kernel computing relu(...relu(x@W0+b0)...@W_{L-1}+b_{L-1}) on one tile."""

    def kernel(*refs):
        # refs = (x_ref, w0_ref, b0_ref, ..., w_{L-1}_ref, b_{L-1}_ref, o_ref)
        x_ref = refs[0]
        o_ref = refs[-1]
        h = x_ref[...]                                      # f32
        for li in range(num_layers):
            w_ref = refs[1 + 2 * li]                        # bf16, (in_pad, out_pad)
            b_ref = refs[2 + 2 * li]                        # f32,  (1, out_pad)
            # MXU: bf16 x bf16 inputs, f32 accumulation.  Epilogue in f32 on VPU.
            y = jnp.dot(h.astype(jnp.bfloat16), w_ref[...],
                        preferred_element_type=jnp.float32)
            h = jnp.maximum(y + b_ref[...], 0.0)
        o_ref[...] = h.astype(o_ref.dtype)

    return kernel


def fused_mlp_forward(x, w_ts, b_rows, *, out_dim, batch_tile=_BATCH_TILE):
    """Whole Linear+ReLU stack in ONE pallas_call."""
    num_layers = len(w_ts)
    batch, d_in = x.shape

    args = [x]
    for w_t, b_row in zip(w_ts, b_rows):
        args.append(w_t)
        args.append(b_row)

    # Advisory cost hint for XLA's scheduler.
    flops = 2 * batch * sum(int(w.shape[0]) * int(w.shape[1]) for w in w_ts)
    bytes_accessed = (
        int(x.size) * x.dtype.itemsize
        + sum(int(w.size) * w.dtype.itemsize for w in w_ts)
        + sum(int(b.size) * b.dtype.itemsize for b in b_rows)
        + batch * out_dim * 4)
    cost = pl.CostEstimate(flops=flops, transcendentals=0,
                           bytes_accessed=bytes_accessed)

    kernel = _make_fused_mlp_kernel(num_layers)
    out_shape = jax.ShapeDtypeStruct((batch, out_dim), jnp.float32)

    use_grid = (batch_tile is not None
                and batch > batch_tile
                and batch % batch_tile == 0)

    if not use_grid:
        # Small batch: grid-less, whole arrays resident in VMEM (single TC).
        return pl.pallas_call(
            kernel,
            out_shape=out_shape,
            in_specs=[pl.BlockSpec(memory_space=pltpu.MemorySpace.VMEM)] * len(args),
            out_specs=pl.BlockSpec(memory_space=pltpu.MemorySpace.VMEM),
            cost_estimate=cost,
        )(*args)

    # Large batch: 1-D parallel grid over batch rows; weights/biases keep a
    # constant block index so they stay VMEM-resident across grid steps.
    tb = batch_tile
    in_specs = [pl.BlockSpec((tb, d_in), lambda i: (i, 0))]
    for w_t, b_row in zip(w_ts, b_rows):
        in_specs.append(pl.BlockSpec(w_t.shape, lambda i: (0, 0)))
        in_specs.append(pl.BlockSpec(b_row.shape, lambda i: (0, 0)))
    out_specs = pl.BlockSpec((tb, out_dim), lambda i: (i, 0))

    return pl.pallas_call(
        kernel,
        out_shape=out_shape,
        grid=(batch // tb,),
        in_specs=in_specs,
        out_specs=out_specs,
        compiler_params=pltpu.CompilerParams(
            dimension_semantics=("parallel",)),
        cost_estimate=cost,
    )(*args)


class CondVariationalEncoderPallas:
    """JAX/Pallas port of CondVariationalEncoder (Linear+ReLU stack, fully fused)."""

    def __init__(self, encoder_dims, key,
                 batch_normalization=False, dropout_rate=None):
        # TODO(synk): batch_normalization / dropout not implemented (defaults
        # are off in the reference module); forward is the pure Linear+ReLU stack.
        assert not batch_normalization and dropout_rate is None
        self.encoder_dims = list(encoder_dims)
        self.out_dim = int(encoder_dims[-1])

        # PyTorch-style parameters (faithful nn.Linear default init).
        self.weights = []   # (out, in), f32
        self.biases = []    # (out,),    f32
        for i in range(len(encoder_dims) - 1):
            fan_in, fan_out = encoder_dims[i], encoder_dims[i + 1]
            key, kw, kb = jax.random.split(key, 3)
            # nn.Linear default: kaiming_uniform_(a=sqrt(5)) -> bound = 1/sqrt(fan_in)
            bound = 1.0 / math.sqrt(fan_in)
            w = jax.random.uniform(kw, (fan_out, fan_in), jnp.float32,
                                   minval=-bound, maxval=bound)
            b = jax.random.uniform(kb, (fan_out,), jnp.float32,
                                   minval=-bound, maxval=bound)
            self.weights.append(w)
            self.biases.append(b)

        # Kernel-friendly parameters, computed ONCE:
        #  - transpose weights to (in, out) so the matmul output is lane-dense
        #  - zero-pad every INTERMEDIATE layer's output dim (and the next layer's
        #    matching input dim) up to a multiple of 128; padding is exact
        #    (0 weight cols + 0 bias + ReLU -> exactly 0)
        #  - the LAST layer's output dim stays unpadded (single masked vst)
        #  - weights cast to bf16 (MXU input dtype), biases stay f32 as (1, out)
        num_layers = len(self.weights)
        padded = [int(encoder_dims[0])]
        for li in range(num_layers):
            dout = int(encoder_dims[li + 1])
            padded.append(dout if li == num_layers - 1 else _round_up(dout, _LANE))

        self._w_ts = []
        self._b_rows = []
        for li, (w, b) in enumerate(zip(self.weights, self.biases)):
            din, dout = int(w.shape[1]), int(w.shape[0])
            din_pad, dout_pad = padded[li], padded[li + 1]
            w_t = jnp.transpose(w)                                    # (in, out)
            w_t = jnp.pad(w_t, ((0, din_pad - din), (0, dout_pad - dout)))
            b_row = jnp.pad(b, (0, dout_pad - dout)).reshape(1, -1)   # (1, out_pad)
            self._w_ts.append(w_t.astype(jnp.bfloat16))
            self._b_rows.append(b_row.astype(jnp.float32))

        # Single jitted dispatch for the whole forward pass.
        self._forward = jax.jit(
            functools.partial(fused_mlp_forward, out_dim=self.out_dim))

    def __call__(self, x):
        # x: (batch, encoder_dims[0]) float32
        return self._forward(x, self._w_ts, self._b_rows)


def _reference_forward(model, x):
    """Plain-JAX reference mirroring the kernel math (bf16 matmul, f32 epilogue)."""
    h = x
    for w, b in zip(model.weights, model.biases):
        y = jnp.dot(h.astype(jnp.bfloat16), w.T.astype(jnp.bfloat16),
                    preferred_element_type=jnp.float32)
        h = jnp.maximum(y + b, 0.0)
    return h


if __name__ == "__main__":
    key = jax.random.PRNGKey(0)
    k_param, k_x1, k_x2 = jax.random.split(key, 3)

    encoder_dims = [32, 64, 16]   # small MLP consistent with the module
    model = CondVariationalEncoderPallas(encoder_dims, k_param)

    # Small batch -> grid-less path (whole arrays resident in VMEM, one TC).
    x_small = jax.random.normal(k_x1, (8, encoder_dims[0]), jnp.float32)
    out_small = jax.block_until_ready(model(x_small))
    ref_small = _reference_forward(model, x_small)
    assert out_small.shape == (8, encoder_dims[-1])
    assert jnp.allclose(out_small, ref_small, atol=1e-4, rtol=1e-4), \
        "small-batch mismatch vs reference"

    # Larger batch -> 1-D parallel grid over batch (uses both TCs on v7x).
    x_big = jax.random.normal(k_x2, (1024, encoder_dims[0]), jnp.float32)
    out_big = jax.block_until_ready(model(x_big))
    ref_big = _reference_forward(model, x_big)
    assert out_big.shape == (1024, encoder_dims[-1])
    assert jnp.allclose(out_big, ref_big, atol=1e-4, rtol=1e-4), \
        "batch-tiled mismatch vs reference"

    print("KERNEL_OK")
</pallas_src>

<mosaic_0001>
module attributes {stable_mosaic.version = 11 : i64} {
  func.func @kernel(%arg0: memref<8x32xf32, #tpu.memory_space<vmem>>, %arg1: memref<32x128xbf16, #tpu.memory_space<vmem>>, %arg2: memref<1x128xf32, #tpu.memory_space<vmem>>, %arg3: memref<128x16xbf16, #tpu.memory_space<vmem>>, %arg4: memref<1x16xf32, #tpu.memory_space<vmem>>, %arg5: memref<8x16xf32, #tpu.memory_space<vmem>>) attributes {dimension_semantics = [], scalar_prefetch = 0 : i64, scratch_operands = 0 : i64, tpu.core_type = #tpu.core_type<tc>} {
    %c0 = arith.constant 0 : index
    %c0_0 = arith.constant 0 : index
    %0 = vector.load %arg0[%c0, %c0_0] : memref<8x32xf32, #tpu.memory_space<vmem>>, vector<8x32xf32>
    %1 = arith.truncf %0 : vector<8x32xf32> to vector<8x32xbf16>
    %c0_1 = arith.constant 0 : index
    %c0_2 = arith.constant 0 : index
    %2 = vector.load %arg1[%c0_1, %c0_2] : memref<32x128xbf16, #tpu.memory_space<vmem>>, vector<32x128xbf16>
    %cst = arith.constant dense<0.000000e+00> : vector<8x128xf32>
    %3 = tpu.matmul %1, %2, %cst {dimension_numbers = #tpu.dot_dimension_numbers<[1], [0], [0], [1], [0, 0, 1, 1], [], []>} : vector<8x32xbf16>, vector<32x128xbf16>, vector<8x128xf32> -> vector<8x128xf32>
    %c0_3 = arith.constant 0 : index
    %c0_4 = arith.constant 0 : index
    %4 = vector.load %arg2[%c0_3, %c0_4] : memref<1x128xf32, #tpu.memory_space<vmem>>, vector<1x128xf32>
    %5 = vector.broadcast %4 : vector<1x128xf32> to vector<8x128xf32>
    %6 = arith.addf %3, %5 : vector<8x128xf32>
    %cst_5 = arith.constant 0.000000e+00 : f32
    %7 = vector.broadcast %cst_5 : f32 to vector<8x128xf32>
    %8 = arith.maximumf %6, %7 : vector<8x128xf32>
    %9 = arith.truncf %8 : vector<8x128xf32> to vector<8x128xbf16>
    %c0_6 = arith.constant 0 : index
    %c0_7 = arith.constant 0 : index
    %10 = vector.load %arg3[%c0_6, %c0_7] : memref<128x16xbf16, #tpu.memory_space<vmem>>, vector<128x16xbf16>
    %cst_8 = arith.constant dense<0.000000e+00> : vector<8x16xf32>
    %11 = tpu.matmul %9, %10, %cst_8 {dimension_numbers = #tpu.dot_dimension_numbers<[1], [0], [0], [1], [0, 0, 1, 1], [], []>} : vector<8x128xbf16>, vector<128x16xbf16>, vector<8x16xf32> -> vector<8x16xf32>
    %c0_9 = arith.constant 0 : index
    %c0_10 = arith.constant 0 : index
    %12 = vector.load %arg4[%c0_9, %c0_10] : memref<1x16xf32, #tpu.memory_space<vmem>>, vector<1x16xf32>
    %13 = vector.broadcast %12 : vector<1x16xf32> to vector<8x16xf32>
    %14 = arith.addf %11, %13 : vector<8x16xf32>
    %cst_11 = arith.constant 0.000000e+00 : f32
    %15 = vector.broadcast %cst_11 : f32 to vector<8x16xf32>
    %16 = arith.maximumf %14, %15 : vector<8x16xf32>
    %c0_12 = arith.constant 0 : index
    %c0_13 = arith.constant 0 : index
    %17 = vector.load %arg5[%c0_12, %c0_13] : memref<8x16xf32, #tpu.memory_space<vmem>>, vector<8x16xf32>
    tpu.vector_store %arg5[%c0_12, %c0_13], %16 {strides = array<i32>} : memref<8x16xf32, #tpu.memory_space<vmem>>, vector<8x16xf32>,
    return
  }
}

</mosaic_0001>

<bundles_post_ra>
// kernel: fused_mlp_forward.1
= control target key start
LH: loop header
LB: loop body
LE: loop exit
PB: predicated region body
PF: predicated region fallthrough
CT: control target
= control target key end

     0   :  { %v309_v1 = vmov 0.0   ;;  %vm310_vm0 = vmmov 0   ;;  %vm47_vm1 = vcmask 261120   ;;  %s384_s0 = inlined_call_operand.vmem [shape: f32[8,32], index: 0, kind: input, shape index: {}]   ;;  %s385_s1 = inlined_call_operand.vmem [shape: bf16[32,128], index: 1, kind: input, shape index: {}]   ;;  %s386_s2 = inlined_call_operand.vmem [shape: f32[1,128], index: 2, kind: input, shape index: {}]   ;;  %s387_s3 = inlined_call_operand.vmem [shape: bf16[128,16], index: 3, kind: input, shape index: {}]   ;;  %s388_s4 = inlined_call_operand.vmem [shape: f32[1,16], index: 4, kind: input, shape index: {}]   ;;  %s389_s5 = inlined_call_operand.hbm [shape: f32[8,16], index: 5, kind: output, shape index: {}]  }
   0x1   :  { %v277_v0 = vld [vmem:[%s385_s1 + $0x8] sm:$0xff]   ;;  %246 = vmatprep.subr.bf16.mxu0 %v309_v1  ;;  %v278_v2 = vld [vmem:[%s385_s1] sm:$0xff]   ;;  %254 = vmatprep.subr.bf16.mxu1 %v309_v1  ;;  %v279_v4 = vld [vmem:[%s387_s3 + $0x38] sm:$0xff]  }
   0x2   :  { %247 = vmatpush3.bf16.msra.mxu0 %v277_v0  ;;  %250 = vmatprep.mubr.msk.bf16.mxu0 %vm310_vm0, %v309_v1  ;;  %v22_v3 = vld [vmem:[%s384_s0] sm:$0xff]  ;;  %v280_v6 = vld [vmem:[%s387_s3 + $0x30] sm:$0xff]   ;;  %v281_v7 = vld [vmem:[%s387_s3 + $0x28] sm:$0xff]  }
   0x3   :  { %248 = vmatprep.subr.bf16.mxu0 %v309_v1  ;;  %270 = vmatprep.mubr.msk.bf16.mxu1 %vm310_vm0, %v309_v1  ;;  %v23_v5 = vpack.c.bf16 %v22_v3, %v22_v3 }
   0x4   :  { %255 = vmatpush3.bf16.msra.mxu1 %v279_v4 }
   0x5   :  { %256 = vmatprep.subr.bf16.mxu1 %v309_v1 }
   0x6   :  { %249 = vmatpush3.bf16.msra.mxu0 %v278_v2 }
   0x8   :  { %257 = vmatpush3.bf16.msra.mxu1 %v280_v6 }
   0x9   :  { %251 = vmatmul.mubr.msk.bf16.vlgmr.msra.gmra.mxu0 %vm47_vm1, %v23_v5  ;;  %258 = vmatprep.subr.bf16.mxu1 %v309_v1 }
   0xa   :  { %10 = vsyncpa [#allocation3], 0  ;;  %v282_v8 = vld [vmem:[%s387_s3 + $0x20] sm:$0xff]   ;;  %v283_v9 = vld [vmem:[%s387_s3 + $0x18] sm:$0xff]   ;;  %s311_s17 = smov [#allocation2]   ;;  %vm205_vm2 = vcmask 130048  }
   0xb   :  { %v284_v10 = vld [vmem:[%s387_s3 + $0x10] sm:$0xff]   ;;  %v285_v11 = vld [vmem:[%s387_s3 + $0x8] sm:$0xff]   ;;  %v286_v12 = vld [vmem:[%s387_s3] sm:$0xff]   ;;  %s213_s3 = sshll.u32 %s311_s17, 4  ;;  %s214_s3 = int_to_ptr.vmem [resolvable:$true] %s213_s3 }
   0xc   :  { %259 = vmatpush3.bf16.msra.mxu1 %v281_v7  ;;  %v221_v13 = vld [vmem:[%s386_s2] ss:$0 sm:$0xff]  ;;  %s287_s2 = scalar_lea.vmem %s214_s3, 128  ;;  %p292_p1 = scmp.lt.s32.totalorder %s214_s3, %s214_s3 }
   0xd   :  { %260 = vmatprep.subr.bf16.mxu1 %v309_v1  ;;  %v225_v21 = vld [vmem:[%s388_s4] ss:$0 sm:$0xff]  ;;  %p288_p0 = scmp.ne.s32.totalorder %s214_s3, %s287_s2  ;;  %p293_p2 = scmp.lt.s32.totalorder %s287_s2, %s287_s2 }
   0xf   :  { %p294_p3 = por %p293_p2, %p292_p1 }
  0x10   :  { %261 = vmatpush3.bf16.msra.mxu1 %v282_v8 }
  0x11   :  { %262 = vmatprep.subr.bf16.mxu1 %v309_v1  ;;  %p295_p4 = pnand %p294_p3, %p288_p0 }
  0x14   :  { %263 = vmatpush3.bf16.msra.mxu1 %v283_v9 }
  0x15   :  { %264 = vmatprep.subr.bf16.mxu1 %v309_v1 }
  0x18   :  { %265 = vmatpush3.bf16.msra.mxu1 %v284_v10 }
  0x19   :  { %266 = vmatprep.subr.bf16.mxu1 %v309_v1 }
  0x1c   :  { %267 = vmatpush3.bf16.msra.mxu1 %v285_v11 }
  0x1d   :  { %268 = vmatprep.subr.bf16.mxu1 %v309_v1 }
  0x20   :  { %269 = vmatpush3.bf16.msra.mxu1 %v286_v12 }
  0xc9   :  { %v85_v14 = vpop.f32.mrf.mxu0 }
  0xca   :  { %v86_v15 = vadd.f32 %v221_v13, %v85_v14 }
  0xcb   :  { %v252_v16 = vpop.f32.mrf.mxu0 }
  0xcc   :  { %v91_v17 = vmax.f32 %v86_v15, 0.0 }
  0xcd   :  { %v88_v18 = vpop.f32.mrf.mxu0 }
  0xce   :  { %v92_v19 = vpack.c.bf16 %v91_v17, %v91_v17 }
  0xcf   :  { %v253_v20 = vpop.f32.mrf.mxu0 }
  0xd0   :  { %271 = vmatmul.mubr.bf16.vlgmr.msra.gmra.mxu1 %v92_v19 }
 0x190   :  { %v198_v22 = vpop.f32.mrf.mxu1 }
 0x191   :  { %v199_v23 = vadd.f32 %v225_v21, %v198_v22 }
 0x192   :  { %v272_v24 = vpop.f32.mrf.mxu1 }
 0x193   :  { %v204_v25 = vmax.f32 %v199_v23, 0.0 }
 0x194   :  { %v201_v26 = vpop.f32.mrf.mxu1 }
 0x195   :  { %206 = vst.msk [vmem:[#allocation2] sm:$0xff] %vm205_vm2, %v204_v25 }
 0x196   :  { %v273_v27 = vpop.f32.mrf.mxu1 }
 0x197   :  { %298 = shalt.err (!%p295_p4)
}
 0x198   :  { %216 = dma.vmem_to_hbm [thread:$0]  %s214_s3, 128, %s389_s5, [#allocation3]  }
 0x199   :  { %307 = dma.done.wait [#allocation3], 128  }
 0x19a   :  { %308 = vsyncadd [#allocation3], 4294967168 }
 0x19b   :  { %220 = vsyncpa [#allocation3], 1 }

</bundles_post_ra>
